<compile_context>
chip_gen: v7x
topology: tpu7x:2x2x1
jax: 0.10.0
libtpu: 0.0.40
codegen_flags: <defaults>
</compile_context>

<pallas_src>
import functools

import jax
import jax.numpy as jnp
from jax import lax
from jax.experimental import pallas as pl
from jax.experimental.pallas import tpu as pltpu

IN_DIM = 128     # layers[0]
HID_DIM = 8      # layers[1]
OUT_DIM = 1      # final Linear(layers[-1], 1)

MAX_BLOCK_B = 16384   # keeps 2x double-buffered x tiles well under v7x VMEM


def _round_up(x, m):
    return ((x + m - 1) // m) * m


def _predict_kernel(x_ref, w1t_ref, b1c_ref, w2c_ref, b2_ref, o_ref):
    # x_ref:   (block_b, IN_DIM)   VMEM tile of the batch
    # w1t_ref: (HID_DIM, IN_DIM)   VMEM (resident, W1 transposed)
    # b1c_ref: (HID_DIM, 1)        VMEM (resident, b1 as a column)
    # w2c_ref: (HID_DIM, 1)        VMEM (resident, W2 as a column)
    # b2_ref:  (1, 1)              SMEM scalar
    # o_ref:   (OUT_DIM, block_b)  VMEM, lane-dense output row
    x = x_ref[...]
    # hT = W1^T @ x^T, computed by contracting IN_DIM of both operands
    # (transposed-RHS matmul, identical form to q @ k^T in flash attention).
    # Result is lane-dense (HID_DIM, block_b): bias + ReLU only touch
    # block_b/128 dense vregs instead of a block_b x 8 lane-sparse layout.
    hT = lax.dot_general(
        w1t_ref[...], x,
        dimension_numbers=(((1,), (1,)), ((), ())),
        preferred_element_type=jnp.float32,
    )                                               # (HID_DIM, block_b)
    hT = jnp.maximum(hT + b1c_ref[...], 0.0)        # ReLU; Dropout(p=0) = identity
    # 8 -> 1 layer: VPU multiply + 8-sublane reduce -> unmasked (1, block_b) row.
    yT = jnp.sum(hT * w2c_ref[...], axis=0, keepdims=True) + b2_ref[0, 0]
    o_ref[...] = yT.astype(o_ref.dtype)


@functools.partial(jax.jit, static_argnames=("block_b",))
def predict_layer(x, w1, b1, w2, b2, *, block_b=8192):
    """x: (B, IN_DIM) -> (B, OUT_DIM)."""
    B = x.shape[0]
    assert x.shape[1] == IN_DIM

    # Lane-dense batch tile (multiple of 128), clamped so tiny batches are not
    # over-padded and capped so double-buffered tiles always fit VMEM (v7x).
    bb = min(_round_up(block_b, 128), _round_up(B, 128), MAX_BLOCK_B)
    bb = max(bb, 128)
    # Keep both v7x TensorCores busy: if the whole batch would be one grid
    # step but is big enough to split, halve the tile so num_tiles >= 2.
    if pl.cdiv(B, bb) == 1 and B > 256:
        bb = max(128, _round_up(pl.cdiv(B, 2), 128))
    num_tiles = pl.cdiv(B, bb)

    w1t = w1.T                        # (HID_DIM, IN_DIM) = (8, 128)
    b1c = b1.reshape(HID_DIM, 1)      # (8, 1)
    w2c = w2.reshape(HID_DIM, 1)      # (8, 1)
    b2s = b2.reshape(1, 1)

    # Memory-bound cost hint for XLA's scheduler.
    nbytes = x.dtype.itemsize
    cost = pl.CostEstimate(
        flops=2 * B * IN_DIM * HID_DIM + 2 * B * HID_DIM,
        transcendentals=0,
        bytes_accessed=(B * IN_DIM * nbytes + B * OUT_DIM * nbytes
                        + (IN_DIM * HID_DIM + 2 * HID_DIM + 1) * 4),
    )

    out = pl.pallas_call(
        _predict_kernel,
        out_shape=jax.ShapeDtypeStruct((OUT_DIM, B), x.dtype),
        grid_spec=pltpu.PrefetchScalarGridSpec(
            num_scalar_prefetch=0,
            grid=(num_tiles,),
            in_specs=[
                # TODO(synk): if the upstream producer can supply bf16 x, feed
                # it directly (halves HBM traffic); do not cast in the wrapper.
                pl.BlockSpec((bb, IN_DIM), lambda i: (i, 0)),          # x tile
                pl.BlockSpec((HID_DIM, IN_DIM), lambda i: (0, 0)),     # W1^T
                pl.BlockSpec((HID_DIM, 1), lambda i: (0, 0)),          # b1 col
                pl.BlockSpec((HID_DIM, 1), lambda i: (0, 0)),          # W2 col
                pl.BlockSpec(memory_space=pltpu.MemorySpace.SMEM),     # b2
            ],
            # Lane-dense (1, bb) output row per grid step (unmasked stores for
            # full tiles; only the final partial tile uses masked writeback).
            out_specs=pl.BlockSpec((OUT_DIM, bb), lambda i: (0, i)),
        ),
        compiler_params=pltpu.CompilerParams(
            dimension_semantics=("parallel",),   # batch tiles shard across TCs
        ),
        cost_estimate=cost,
    )(x, w1t, b1c, w2c, b2s)

    # (1, B) -> (B, 1)
    return out.reshape(B, OUT_DIM)


def _init_params(key):
    """Deterministic PyTorch-style init: U(-1/sqrt(fan_in), 1/sqrt(fan_in))."""
    k1, k2, k3, k4 = jax.random.split(key, 4)
    bound1 = 1.0 / jnp.sqrt(IN_DIM)
    bound2 = 1.0 / jnp.sqrt(HID_DIM)
    w1 = jax.random.uniform(k1, (IN_DIM, HID_DIM), jnp.float32, -bound1, bound1)
    b1 = jax.random.uniform(k2, (1, HID_DIM), jnp.float32, -bound1, bound1)
    w2 = jax.random.uniform(k3, (HID_DIM, OUT_DIM), jnp.float32, -bound2, bound2)
    b2 = jax.random.uniform(k4, (1, OUT_DIM), jnp.float32, -bound2, bound2)
    return w1, b1, w2, b2


def _reference(x, w1, b1, w2, b2):
    h = jnp.maximum(x @ w1 + b1, 0.0)
    return h @ w2 + b2


if __name__ == "__main__":
    key = jax.random.PRNGKey(0)
    kx, kp = jax.random.split(key)

    batch = 200   # not a multiple of the tile -> exercises the partial tail block
    x = jax.random.normal(kx, (batch, IN_DIM), jnp.float32)
    w1, b1, w2, b2 = _init_params(kp)

    ref = _reference(x, w1, b1, w2, b2)

    # Small explicit tile -> 2 grid steps (both TCs busy on v7x), partial tail.
    out_small = jax.block_until_ready(predict_layer(x, w1, b1, w2, b2, block_b=128))
    # Default (large-tile) path; clamps itself for this small demo batch.
    out_default = jax.block_until_ready(predict_layer(x, w1, b1, w2, b2))

    for out in (out_small, out_default):
        assert out.shape == (batch, OUT_DIM)
        assert jnp.allclose(out, ref, atol=1e-4, rtol=1e-4), float(
            jnp.max(jnp.abs(out - ref)))

    print("KERNEL_OK")
</pallas_src>

<mosaic_0001>
module attributes {stable_mosaic.version = 11 : i64} {
  func.func @_predict_kernel(%arg0: i32, %arg1: memref<128x128xf32, #tpu.memory_space<vmem>>, %arg2: memref<8x128xf32, #tpu.memory_space<vmem>>, %arg3: memref<8x1xf32, #tpu.memory_space<vmem>>, %arg4: memref<8x1xf32, #tpu.memory_space<vmem>>, %arg5: memref<1x1xf32, #tpu.memory_space<smem>>, %arg6: memref<1x128xf32, #tpu.memory_space<vmem>>) attributes {dimension_semantics = [#tpu.dimension_semantics<parallel>], iteration_bounds = array<i64: 2>, scalar_prefetch = 0 : i64, scratch_operands = 0 : i64, tpu.core_type = #tpu.core_type<tc>, window_params = [{transform_indices = @transform_0, window_bounds = array<i64: 128, 128>}, {pipeline_mode = #tpu.pipeline_mode<synchronous>, transform_indices = @transform_1, window_bounds = array<i64: 8, 128>}, {pipeline_mode = #tpu.pipeline_mode<synchronous>, transform_indices = @transform_2, window_bounds = array<i64: 8, 1>}, {pipeline_mode = #tpu.pipeline_mode<synchronous>, transform_indices = @transform_3, window_bounds = array<i64: 8, 1>}, {transform_indices = @transform_4, window_bounds = array<i64: 1, 1>}, {transform_indices = @transform_5, window_bounds = array<i64: 1, 128>}]} {
    %c0 = arith.constant 0 : index
    %c0_0 = arith.constant 0 : index
    %0 = vector.load %arg1[%c0, %c0_0] : memref<128x128xf32, #tpu.memory_space<vmem>>, vector<128x128xf32>
    %c0_1 = arith.constant 0 : index
    %c0_2 = arith.constant 0 : index
    %1 = vector.load %arg2[%c0_1, %c0_2] : memref<8x128xf32, #tpu.memory_space<vmem>>, vector<8x128xf32>
    %cst = arith.constant dense<0.000000e+00> : vector<8x128xf32>
    %2 = tpu.matmul %1, %0, %cst {dimension_numbers = #tpu.dot_dimension_numbers<[1], [1], [0], [0], [0, 0, 1, 0], [], []>} : vector<8x128xf32>, vector<128x128xf32>, vector<8x128xf32> -> vector<8x128xf32>
    %c0_3 = arith.constant 0 : index
    %c0_4 = arith.constant 0 : index
    %3 = vector.load %arg3[%c0_3, %c0_4] : memref<8x1xf32, #tpu.memory_space<vmem>>, vector<8x1xf32>
    %4 = vector.broadcast %3 : vector<8x1xf32> to vector<8x128xf32>
    %5 = arith.addf %2, %4 : vector<8x128xf32>
    %cst_5 = arith.constant 0.000000e+00 : f32
    %6 = vector.broadcast %cst_5 : f32 to vector<8x128xf32>
    %7 = arith.maximumf %5, %6 : vector<8x128xf32>
    %c0_6 = arith.constant 0 : index
    %c0_7 = arith.constant 0 : index
    %8 = vector.load %arg4[%c0_6, %c0_7] : memref<8x1xf32, #tpu.memory_space<vmem>>, vector<8x1xf32>
    %9 = vector.broadcast %8 : vector<8x1xf32> to vector<8x128xf32>
    %10 = arith.mulf %7, %9 : vector<8x128xf32>
    %cst_8 = arith.constant dense<0.000000e+00> : vector<128xf32>
    %11 = vector.multi_reduction <add>, %10, %cst_8 [0] : vector<8x128xf32> to vector<128xf32>
    %12 = vector.shape_cast %11 : vector<128xf32> to vector<1x128xf32>
    %c0_9 = arith.constant 0 : index
    %c0_10 = arith.constant 0 : index
    %13 = memref.load %arg5[%c0_9, %c0_10] : memref<1x1xf32, #tpu.memory_space<smem>>
    %14 = vector.broadcast %13 : f32 to vector<1x128xf32>
    %15 = arith.addf %12, %14 : vector<1x128xf32>
    %c0_11 = arith.constant 0 : index
    %c0_12 = arith.constant 0 : index
    %16 = vector.load %arg6[%c0_11, %c0_12] : memref<1x128xf32, #tpu.memory_space<vmem>>, vector<1x128xf32>
    tpu.vector_store %arg6[%c0_11, %c0_12], %15 {strides = array<i32>} : memref<1x128xf32, #tpu.memory_space<vmem>>, vector<1x128xf32>,
    return
  }
  func.func @transform_0(%arg0: i32) -> (i32, i32) {
    %c0_i32 = arith.constant 0 : i32
    %c0_i32_0 = arith.constant 0 : i32
    return %arg0, %c0_i32 : i32, i32
  }
  func.func @transform_1(%arg0: i32) -> (i32, i32) {
    %c0_i32 = arith.constant 0 : i32
    %c0_i32_0 = arith.constant 0 : i32
    %c0_i32_1 = arith.constant 0 : i32
    return %c0_i32, %c0_i32_0 : i32, i32
  }
  func.func @transform_2(%arg0: i32) -> (i32, i32) {
    %c0_i32 = arith.constant 0 : i32
    %c0_i32_0 = arith.constant 0 : i32
    %c0_i32_1 = arith.constant 0 : i32
    return %c0_i32, %c0_i32_0 : i32, i32
  }
  func.func @transform_3(%arg0: i32) -> (i32, i32) {
    %c0_i32 = arith.constant 0 : i32
    %c0_i32_0 = arith.constant 0 : i32
    %c0_i32_1 = arith.constant 0 : i32
    return %c0_i32, %c0_i32_0 : i32, i32
  }
  func.func @transform_4(%arg0: i32) -> (i32, i32) {
    %c0_i32 = arith.constant 0 : i32
    %c0_i32_0 = arith.constant 0 : i32
    %c0_i32_1 = arith.constant 0 : i32
    return %c0_i32, %c0_i32_0 : i32, i32
  }
  func.func @transform_5(%arg0: i32) -> (i32, i32) {
    %c0_i32 = arith.constant 0 : i32
    %c0_i32_0 = arith.constant 0 : i32
    return %c0_i32, %arg0 : i32, i32
  }
}

</mosaic_0001>

<bundles_post_ra>
// kernel: predict_layer.1
= control target key start
LH: loop header
LB: loop body
LE: loop exit
PB: predicated region body
PF: predicated region fallthrough
CT: control target
= control target key end

     0   :  { %s904_s0 = inlined_call_operand.hbm [shape: f32[200,128], index: 0, kind: input, shape index: {}]   ;;  %s905_s1 = inlined_call_operand.vmem [shape: f32[8,128], index: 1, kind: input, shape index: {}]   ;;  %s906_s2 = inlined_call_operand.vmem [shape: f32[8,1], index: 2, kind: input, shape index: {}]   ;;  %s907_s3 = inlined_call_operand.vmem [shape: f32[8,1], index: 3, kind: input, shape index: {}]   ;;  %s908_s4 = inlined_call_operand.<no memory space> [shape: f32[1,1], index: 4, kind: input, shape index: {}]   ;;  %s909_s5 = inlined_call_operand.hbm [shape: f32[1,200], index: 5, kind: output, shape index: {}]  }
   0x1   :  { %10 = sst [smem:[#allocation2]] %s908_s4 }
   0x2   :  { %11 = vsyncpa [#allocation4], 0 }
   0x3   :  { %13 = vsyncpa [#allocation4 + $0x1], 0 }
   0x4   :  { %14 = vsyncpa [#allocation5], 0 }
   0x5   :  { %16 = vsyncpa [#allocation5 + $0x1], 0  ;;  %s720_s20 = smov 0   ;;  %s722_s21 = smov 0  }
   0x6   :  { %s724_s22 = smov 0   ;;  %s726_s23 = smov 0  }
   0x7 LB: > { %s741_s4 = sadd.s32 4294967295, %s677_s23   ;;  %s444_s24 = sadd.s32 4294967294, %s677_s23   ;;  %s677_s23 = sphi %s726_s23, %s919_s23   ;;  %s673_s22 = sphi %s724_s22, %s918_s22   ;;  %s669_s21 = sphi %s722_s21, %s917_s21   ;;  %s665_s20 = sphi %s720_s20, %s916_s20  }
   0x8   : > { %s745_s25 = sadd.s32 1, %s677_s23   ;;  %s29_s26 = sadd.s32 1, %s673_s22 }
   0x9   : > { %s26_s27 = ssub.s32 %s677_s23, %s745_s25  ;;  %p36_p0 = scmp.ne.s32.totalorder %s673_s22, %s669_s21 }
   0xa   : > { %p27_p1 = scmp.eq.s32.totalorder %s26_s27, 0  ;;  %p37_p2 = scmp.eq.s32.totalorder %s677_s23, 0 }
   0xb   : > { %p42_p3 = scmp.ne.s32.totalorder %s669_s21, %s665_s20  ;;  %p43_p4 = scmp.eq.s32.totalorder %s741_s4, 0 }
   0xc   : > { %s757_s28 = scalar_select %p27_p1, %s673_s22, %s29_s26  }
   0xd   : > { %p38_p5 = por %p37_p2, %p36_p0  ;;  %p759_p6 = por %p43_p4, %p42_p3 }
   0xe   : > { %p150_p7 = scmp.eq.s32.totalorder %s741_s4, 1  ;;  %p156_p8 = scmp.eq.s32.totalorder %s444_s24, 1 }
   0xf   : > { %p910_p11 = scmp.ge.s32.totalorder %s677_s23, 2 }
  0x10   : > { %p764_p9 = por %p150_p7, %p36_p0  ;;  %p768_p10 = por %p156_p8, %p42_p3 }
  0x11   : > { %184 = sbr.rel (%p910_p11) target bundleno = 59 (0x3b), region = 32 }
  0x12   : > { %s913_s6 = scalar_select %p768_p10, 1, 0 }
  0x18   : > { %187 = sbr.rel (!%p38_p5) target bundleno = 59 (0x3b), region = 36  ;;  %s188_s7 = sand.u32 (%p38_p5), 1, %s673_s22  }
  0x19   : > { %s448_s8 = sshll.u32 (%p38_p5), %s677_s23, 4  ;;  %s447_s9 = sshll.u32 (%p38_p5), %s188_s7, 7 }
  0x1a   : > { %s194_s10 = ssub.s32 (%p38_p5), 25, %s448_s8  ;;  %s780_s13 = scalar_lea.sflag (%p38_p5), [#allocation4], %s188_s7 }
  0x1b   : > { %p195_p12 = scmp.lt.s32.totalorder (%p38_p5), %s194_s10, 16  ;;  %s192_s14 = scalar_lea.vmem (%p38_p5), [#allocation3], %s447_s9 }
  0x1f   : > { %s921_s10 = smov (!%p195_p12, %s194_s10), 16 }
  0x20   : > { %s777_s11 = sshll.u32 %s921_s10, 7 }
  0x21   : > { %s199_s12 = ssub.s32 2048, %s777_s11 }
  0x22   : > { %200 = vsyncadd %s780_s13, %s199_s12  ;;  %p450_p13 = scmp.ne.s32.totalorder %s777_s11, 0  ;;  %s459_s15 = sshll.u32 %s677_s23, 11 }
  0x23   : > { %s788_s18 = scalar_lea.hbm %s904_s0, %s459_s15  ;;  %s205_s19 = sshll.u32 %s192_s14, 4  ;;  %s790_s19 = int_to_ptr.vmem [resolvable:$true] %s205_s19 }
  0x24   : > { %s583_s24 = scalar_lea.hbm %s788_s18, %s777_s11  ;;  %s587_s7 = scalar_lea.hbm %s904_s0, 3200 }
  0x25   : > { %p584_p0 = scmp.ne.s32.totalorder %s788_s18, %s583_s24  ;;  %p588_p3 = scmp.lt.u32.totalorder %s788_s18, %s904_s0 }
  0x26   : > { %p589_p4 = scmp.lt.u32.totalorder %s587_s7, %s583_s24  ;;  %p591_p7 = scmp.lt.u32.totalorder %s583_s24, %s788_s18 }
  0x27   : > { %p585_p1 = pnand %p584_p0, %p450_p13 }
  0x28   : > { %p590_p5 = por %p589_p4, %p588_p3 }
  0x29   : > { %p586_p2 = pneg %p585_p1 }
  0x2a   : > { %p592_p8 = por %p591_p7, %p590_p5 }
  0x2c   : > { %p593_p12 = pnand %p592_p8, %p586_p2 }
  0x2e   : > { %596 = shalt.err (!%p593_p12)
}
  0x2f   : > { %s597_s10 = scalar_lea.vmem %s790_s19, %s777_s11  ;;  %s679_s12 = smov [#allocation3]  }
  0x30   : > { %p598_p0 = scmp.ne.s32.totalorder %s790_s19, %s597_s10  ;;  %s601_s14 = sshll.u32 %s679_s12, 4  ;;  %s602_s14 = int_to_ptr.vmem [resolvable:$false] %s601_s14 }
  0x31   : > { %s603_s15 = scalar_lea.vmem %s602_s14, 4096  ;;  %p604_p10 = scmp.lt.s32.totalorder %s790_s19, %s602_s14 }
  0x32   : > { %p599_p1 = pnand %p598_p0, %p450_p13  ;;  %p605_p3 = scmp.lt.s32.totalorder %s603_s15, %s597_s10 }
  0x34   : > { %p600_p11 = pneg %p599_p1  ;;  %p606_p4 = por %p605_p3, %p604_p10 }
  0x36   : > { %p607_p5 = pnand %p606_p4, %p600_p11 }
  0x38   : > { %610 = shalt.err (!%p607_p5)
}
  0x39   : > { %s680_s16 = smov 128   ;;  %s681_s17 = smov 8  }
  0x3a   : > { %211 = dma.hbm_to_vmem [thread:$0]  (%p450_p13), %s788_s18, %s777_s11, %s790_s19, %s780_s13, %s680_s16, %s680_s16, %s681_s17  }
  0x3b PF: > { %p454_p2 = scmp.ge.s32.totalorder %s677_s23, 1  ;;  %p213_p7 = scmp.lt.s32.totalorder %s677_s23, 3 }
  0x3d   : > { %p214_p8 = pnand %p454_p2, %p213_p7 }
  0x3e   : > { %s820_s24 = sand.u32 (!%p214_p8), 1, %s669_s21  }
  0x3f   : > { %217 = sbr.rel (%p214_p8) target bundleno = 384 (0x180), region = 40  ;;  %s455_s26 = sshll.u32 (!%p214_p8), %s820_s24, 7 }
  0x40   : > { %s220_s27 = scalar_lea.sflag (!%p214_p8), [#allocation4], %s820_s24  ;;  %s824_s7 = scalar_lea.vmem (!%p214_p8), [#allocation3], %s455_s26 }
  0x46   : > { %656 = dma.done.wait (%p759_p6), %s220_s27, 2048  }
  0x47   : > { %658 = vsyncadd (%p759_p6), %s220_s27, 4294965248  ;;  %v682_v0 = vmov 0.0|0.0   ;;  %vm683_vm0 = vmmov 0   ;;  %v684_v1 = vmov 0.0   ;;  %v685_v2 = vmov 0   ;;  %v254_v3 = vld [vmem:[%s824_s7] sm:$0xff] }
  0x48   : > { %512 = vmatprep.subr.bf16.mxu0 %v682_v0  ;;  %509 = vmatprep.mubr.msk.f32.mxu0 %vm683_vm0, %v684_v1  ;;  %v255_v4 = vld [vmem:[%s824_s7 + $0x8] sm:$0xff]  ;;  %v256_v6 = vld [vmem:[%s824_s7 + $0x10] sm:$0xff]  ;;  %v257_v7 = vld [vmem:[%s824_s7 + $0x18] sm:$0xff]  ;;  %s361_s9 = sld [smem:[#allocation2]]  ;;  %s456_s10 = sshll.u32 %s741_s4, 4 }
  0x49   : > { %582 = vset.pattern.permute.xlu0 %v685_v2  ;;  %v513_v5 = vpack.c.bf16 %v255_v4, %v254_v3  ;;  %v271_v8 = vld [vmem:[%s906_s2] sm:$0xff]  ;;  %v516_v9 = vpack.c.bf16 %v257_v7, %v256_v6  ;;  %v259_v12 = vld [vmem:[%s824_s7 + $0x28] sm:$0xff]  ;;  %v260_v14 = vld [vmem:[%s824_s7 + $0x30] sm:$0xff]  ;;  %s248_s12 = scalar_lea.vmem [#allocation6], %s820_s24  ;;  %s860_s17 = scalar_lea.hbm %s909_s5, %s456_s10 }
  0x4a   : > { %274 = vperm.xlu0 %582, %v271_v8   ;;  %v348_v10 = vld [vmem:[%s907_s3] sm:$0xff]  ;;  %v261_v15 = vld [vmem:[%s824_s7 + $0x38] sm:$0xff]  ;;  %v263_v18 = vld [vmem:[%s824_s7 + $0x48] sm:$0xff]  ;;  %s378_s14 = sshll.u32 %s248_s12, 4  ;;  %s366_s26 = scalar_lea.sflag [#allocation5], %s820_s24  ;;  %s862_s14 = int_to_ptr.vmem [resolvable:$true] %s378_s14 }
  0x4b   : > { %514 = vmatpush3.bf16.xpose.msra.mxu0 %v513_v5  ;;  %v258_v11 = vld [vmem:[%s824_s7 + $0x20] sm:$0xff]  ;;  %v522_v16 = vpack.c.bf16 %v261_v15, %v260_v14  ;;  %v264_v20 = vld [vmem:[%s824_s7 + $0x50] sm:$0xff]  ;;  %v265_v21 = vld [vmem:[%s824_s7 + $0x58] sm:$0xff]  ;;  %s611_s27 = scalar_lea.vmem %s862_s14, 16  ;;  %s686_s4 = smov [#allocation6]  }
  0x4c   : > { %515 = vmatprep.subr.bf16.mxu0 %v682_v0  ;;  %v519_v13 = vpack.c.bf16 %v259_v12, %v258_v11  ;;  %v262_v17 = vld [vmem:[%s824_s7 + $0x40] sm:$0xff]  ;;  %v528_v22 = vpack.c.bf16 %v265_v21, %v264_v20  ;;  %v267_v24 = vld [vmem:[%s824_s7 + $0x68] sm:$0xff]  ;;  %v268_v26 = vld [vmem:[%s824_s7 + $0x70] sm:$0xff]  ;;  %p612_p6 = scmp.ne.s32.totalorder %s862_s14, %s611_s27 }
  0x4d   : > { %v525_v19 = vpack.c.bf16 %v263_v18, %v262_v17  ;;  %v266_v23 = vld [vmem:[%s824_s7 + $0x60] sm:$0xff]  ;;  %v269_v27 = vld [vmem:[%s824_s7 + $0x78] sm:$0xff]  ;;  %s615_s7 = sshll.u32 %s686_s4, 4  ;;  %s616_s7 = int_to_ptr.vmem [resolvable:$false] %s615_s7 }
  0x4e   : > { %351 = vperm.xlu0 %582, %v348_v10   ;;  %v531_v25 = vpack.c.bf16 %v267_v24, %v266_v23  ;;  %v534_v28 = vpack.c.bf16 %v269_v27, %v268_v26  ;;  %v270_v29 = vld [vmem:[%s905_s1] sm:$0xff]  ;;  %v362_v42 = vstv %s361_s9  ;;  %p613_p10 = pnand %p612_p6, %p764_p9  ;;  %s617_s29 = scalar_lea.vmem %s616_s7, 32 }
  0x4f   : > { %p618_p13 = scmp.lt.s32.totalorder %s862_s14, %s616_s7  ;;  %p619_p12 = scmp.lt.s32.totalorder %s617_s29, %s611_s27 }
  0x50   : > { %p614_p11 = pneg %p613_p10 }
  0x51   : > { %p620_p0 = por %p619_p12, %p618_p13 }
  0x53   : > { %517 = vmatpush3.bf16.xpose.msra.mxu0 %v516_v9  ;;  %p621_p1 = pnand %p620_p0, %p614_p11 }
  0x54   : > { %518 = vmatprep.subr.bf16.mxu0 %v682_v0 }
  0x5b   : > { %520 = vmatpush3.bf16.xpose.msra.mxu0 %v519_v13 }
  0x5c   : > { %521 = vmatprep.subr.bf16.mxu0 %v682_v0 }
  0x63   : > { %523 = vmatpush3.bf16.xpose.msra.mxu0 %v522_v16 }
  0x64   : > { %524 = vmatprep.subr.bf16.mxu0 %v682_v0 }
  0x6b   : > { %526 = vmatpush3.bf16.xpose.msra.mxu0 %v525_v19 }
  0x6c   : > { %527 = vmatprep.subr.bf16.mxu0 %v682_v0 }
  0x73   : > { %529 = vmatpush3.bf16.xpose.msra.mxu0 %v528_v22 }
  0x74   : > { %530 = vmatprep.subr.bf16.mxu0 %v682_v0 }
  0x7b   : > { %532 = vmatpush3.bf16.xpose.msra.mxu0 %v531_v25 }
  0x7c   : > { %533 = vmatprep.subr.bf16.mxu0 %v682_v0 }
  0x83   : > { %535 = vmatpush3.bf16.xpose.msra.mxu0 %v534_v28 }
  0x8a   : > { %510 = vmatmul.mubr.f32.vlgmr.msra.gmra.mrb[0].mxu0 %v270_v29 }
  0xc9   : > { %v275_v30 = vpop.permute.xlu0 %274 }
  0xcd   : > { %v352_v35 = vpop.permute.xlu0 %351 }
 0x15d   : > { %v343_v31 = vpop.f32.mrb[0].mxu0 }
 0x15e   : > { %v344_v32 = vadd.f32 %v343_v31, %v275_v30  ;;  %v511_v33 = vpop.f32.mrb[1].mxu0 }
 0x160   : > { %v347_v34 = vmax.f32 %v344_v32, 0.0 }
 0x162   : > { %v354_v36 = vmul.f32 %v352_v35, %v347_v34 }
 0x164   : > { %v355_v37 = vrot.slane %v354_v36, 4 }
 0x166   : > { %v356_v38 = vadd.f32 %v355_v37, %v354_v36 }
 0x168   : > { %v357_v39 = vrot.slane %v356_v38, 2 }
 0x16a   : > { %v358_v40 = vadd.f32 %v357_v39, %v356_v38 }
 0x16c   : > { %v359_v41 = vrot.slane %v358_v40, 1 }
 0x16e   : > { %v360_v43 = vadd.f32 %v359_v41, %v358_v40 }
 0x170   : > { %v363_v44 = vadd.f32 %v362_v42, %v360_v43 }
 0x172   : > { %364 = vst [vmem:[%s248_s12] sm:$0x1] %v363_v44 }
 0x173   : > { %624 = shalt.err (!%p621_p1)
}
 0x174   : > { %s625_s24 = scalar_lea.hbm %s860_s17, 16  ;;  %s629_s18 = scalar_lea.hbm %s909_s5, 32 }
 0x175   : > { %p626_p3 = scmp.ne.s32.totalorder %s860_s17, %s625_s24  ;;  %p630_p2 = scmp.lt.u32.totalorder %s860_s17, %s909_s5 }
 0x176   : > { %p631_p7 = scmp.lt.u32.totalorder %s629_s18, %s625_s24  ;;  %p633_p6 = scmp.lt.u32.totalorder %s625_s24, %s860_s17 }
 0x177   : > { %p627_p4 = pnand %p626_p3, %p764_p9 }
 0x178   : > { %p632_p8 = por %p631_p7, %p630_p2 }
 0x179   : > { %p628_p5 = pneg %p627_p4 }
 0x17a   : > { %p634_p10 = por %p633_p6, %p632_p8 }
 0x17c   : > { %p635_p11 = pnand %p634_p10, %p628_p5 }
 0x17e   : > { %638 = shalt.err (!%p635_p11)
}
 0x17f   : > { %537 = dma.vmem_to_hbm [thread:$0]  (%p764_p9), %s862_s14, 16, %s860_s17, %s366_s26  }
 0x180 PF: > { %s390_s9 = sand.u32 1, %s665_s20   ;;  %p914_p13 = scmp.ne.s32.totalorder %s913_s6, 0 }
 0x181   : > { %p915_p12 = scmp.ge.s32.totalorder %s677_s23, 2  ;;  %s391_s10 = scalar_lea.sflag [#allocation5], %s390_s9 }
 0x183   : > { %p540_p0 = pnand %p915_p12, %p914_p13 }
 0x185   : > { %660 = dma.done.wait (!%p540_p0), %s391_s10, 16  }
 0x186   : > { %662 = vsyncadd (!%p540_p0), %s391_s10, 4294967280  ;;  %p19_p1 = scmp.ge.s32.totalorder %s745_s25, 4   ;;  %s916_s20 = smov %s669_s21 }
 0x187   : > { %s917_s21 = smov %s673_s22  ;;  %s918_s22 = smov %s757_s28 }
 0x188   : > { %s919_s23 = smov %s745_s25  ;;  %21 = sbr.rel (!%p19_p1) target bundleno = 7 (0x7), region = 85 }
 0x18f   :  { %395 = vsyncpa [#allocation4], 1 }
 0x190   :  { %397 = vsyncpa [#allocation4 + $0x1], 1 }
 0x191   :  { %398 = vsyncpa [#allocation5], 1 }
 0x192   :  { %400 = vsyncpa [#allocation5 + $0x1], 1 }

</bundles_post_ra>
